<compile_context>
chip_gen: v7x
topology: tpu7x:2x2x1
jax: 0.10.0
libtpu: 0.0.40
codegen_flags: <defaults>
</compile_context>

<pallas_src>
import functools
from typing import List, Sequence

import jax
import jax.numpy as jnp
from jax.experimental import pallas as pl
from jax.experimental.pallas import tpu as pltpu


# ----------------------------------------------------------------------------
# Tile-size heuristic
# ----------------------------------------------------------------------------
def _pick_tiles(batch: int, n_ctx: int, max_rows: int = 1024,
                min_rows: int = 256):
    """Pick (Bt, Nt): batch-elements and context-points per grid step."""
    # Context-point tile: full N when small; otherwise the largest divisor of
    # N that is a multiple of 8 (sublane rule) and <= max_rows.
    if n_ctx <= max_rows:
        nt = n_ctx
    else:
        cands = [d for d in range(8, max_rows + 1, 8) if n_ctx % d == 0]
        nt = max(cands) if cands else n_ctx

    # Batch tile: as many batch elements per step as fit the row budget.
    divs = [d for d in range(1, batch + 1) if batch % d == 0]
    bt = max([d for d in divs if d * nt <= max_rows] or [1])

    # Prefer >= 2 steps on the parallel batch axis (dual v7x TensorCores)
    # when the smaller tile is still reasonable or the problem is tiny anyway.
    if bt == batch and batch > 1:
        smaller = max(d for d in divs if d < batch)
        if smaller * nt >= min_rows or batch * nt <= min_rows:
            bt = smaller
    return bt, nt


# ----------------------------------------------------------------------------
# Fused kernel: MLP (hidden layers) + per-batch context mean + final layer.
# ----------------------------------------------------------------------------
def _fused_encoder_kernel(x_ref, *refs, n_layers: int, inv_n: float,
                          compute_dtype):
    """refs = [w1, b1, ..., wL, bL, o_ref, acc_ref].

    x_ref:   (Bt, Nt, din) block (Bt batch elems, Nt context points).
    o_ref:   (Bt, 1, r_dim) block -> per-batch mean representation.
    acc_ref: (Bt, pre_final_dim) f32 scratch carrying the running sum over
             the context-point chunks (second grid axis).
    """
    acc_ref = refs[-1]
    o_ref = refs[-2]
    params = refs[:-2]

    k = pl.program_id(1)

    @pl.when(k == 0)
    def _init():
        acc_ref[...] = jnp.zeros_like(acc_ref)

    bt, nt, din = x_ref.shape
    h = x_ref[...].reshape(bt * nt, din)

    # Hidden layers 0..L-2: Linear -> ReLU.  MXU operands in compute_dtype,
    # f32 accumulation; bias-add / ReLU stay in f32 (v5e has no bf16 VPU).
    for li in range(n_layers - 1):
        w_ref = params[2 * li]
        b_ref = params[2 * li + 1]
        h = jnp.dot(h.astype(compute_dtype), w_ref[...],
                    preferred_element_type=jnp.float32) + b_ref[...]
        h = jnp.maximum(h, 0.0)

    # Partial context-point sum for this N-chunk: XLU sublane reduction
    # (keeps the MXU slot free), accumulated in the f32 scratch.
    chunk_sum = jnp.sum(h.astype(jnp.float32).reshape(bt, nt, -1), axis=1)
    acc_ref[...] += chunk_sum

    # Final layer applied to the per-batch MEAN (exact: no ReLU after the
    # last layer) -> last matmul shrinks by a factor of N.
    @pl.when(k == pl.num_programs(1) - 1)
    def _finalize():
        m = acc_ref[...] * inv_n                       # (Bt, pre_final) f32
        w_ref = params[-2]
        b_ref = params[-1]
        out = jnp.dot(m.astype(compute_dtype), w_ref[...],
                      preferred_element_type=jnp.float32) + b_ref[...]
        o_ref[...] = out.reshape(bt, 1, -1).astype(o_ref.dtype)


# ----------------------------------------------------------------------------
# Wrapper: one pallas_call for the whole forward pass.
# ----------------------------------------------------------------------------
def fused_deterministic_encoder(context_x: jax.Array,
                                context_y: jax.Array,
                                weights: Sequence[jax.Array],
                                biases: Sequence[jax.Array],
                                num_targets: int,
                                *,
                                compute_dtype=jnp.float32,
                                max_rows: int = 1024) -> jax.Array:
    B, N, dx = context_x.shape
    dy = context_y.shape[-1]
    din = dx + dy
    n_layers = len(weights)
    r_dim = int(weights[-1].shape[-1])
    pre_final_dim = int(weights[-1].shape[0])
    out_dtype = context_x.dtype

    # Pre-concatenate once in HBM (cheap XLA op): one lane-aligned input slab,
    # one per-step DMA, a single MXU push for the first layer.
    inp = jnp.concatenate([context_x, context_y], axis=-1).astype(compute_dtype)

    # Weights cast at the MXU boundary only; biases stay f32.
    params: List[jax.Array] = []
    for w, b in zip(weights, biases):
        params.append(w.astype(compute_dtype))
        params.append(b.astype(jnp.float32))

    bt, nt = _pick_tiles(B, N, max_rows=max_rows)
    grid = (B // bt, N // nt)

    kernel = functools.partial(_fused_encoder_kernel, n_layers=n_layers,
                               inv_n=1.0 / N, compute_dtype=compute_dtype)

    in_specs = [pl.BlockSpec((bt, nt, din), lambda b, k: (b, k, 0))]
    for p in params:
        # Whole-array VMEM-resident weight/bias blocks (constant index_map).
        # (For very large weights on v7x, pipeline_mode=pl.Buffered(1) would
        #  single-buffer them; they are KiB-scale here, so not needed.)
        in_specs.append(pl.BlockSpec(p.shape, lambda b, k: (0, 0)))

    out_spec = pl.BlockSpec((bt, 1, r_dim), lambda b, k: (b, 0, 0))

    # Advisory cost estimate for XLA scheduling around the custom call.
    sizes = [din] + [int(w.shape[-1]) for w in weights]
    flops = 0
    for fan_in, fan_out in zip(sizes[:-2], sizes[1:-1]):    # hidden layers
        flops += 2 * B * N * fan_in * fan_out
    flops += 2 * B * pre_final_dim * r_dim                  # final layer on means
    flops += B * N * pre_final_dim                          # context-point sum
    elem_bytes = jnp.dtype(compute_dtype).itemsize
    bytes_accessed = (elem_bytes * B * N * din
                      + sum(int(p.size) * p.dtype.itemsize for p in params)
                      + jnp.dtype(out_dtype).itemsize * B * r_dim)

    mean = pl.pallas_call(
        kernel,
        out_shape=jax.ShapeDtypeStruct((B, 1, r_dim), out_dtype),
        grid_spec=pltpu.PrefetchScalarGridSpec(
            num_scalar_prefetch=0,
            grid=grid,
            in_specs=in_specs,
            out_specs=out_spec,
            scratch_shapes=[pltpu.VMEM((bt, pre_final_dim), jnp.float32)]),
        compiler_params=pltpu.CompilerParams(
            dimension_semantics=("parallel", "arbitrary")),
        cost_estimate=pl.CostEstimate(flops=int(flops), transcendentals=0,
                                      bytes_accessed=int(bytes_accessed)),
    )(inp, *params)

    # Broadcast to the target-points axis OUTSIDE the kernel (no T-fold
    # redundant HBM stores from the kernel).
    return jnp.broadcast_to(mean, (B, num_targets, r_dim))


# ----------------------------------------------------------------------------
# Deterministic encoder (parameters built deterministically in-script)
# ----------------------------------------------------------------------------
class DeterministicPallas:
    def __init__(self, input_size: int, output_sizes: Sequence[int],
                 key: jax.Array, compute_dtype=jnp.float32):
        self.input_size = input_size
        self.output_sizes = list(output_sizes)
        self.compute_dtype = compute_dtype
        self.weights: List[jax.Array] = []
        self.biases: List[jax.Array] = []
        sizes = [input_size] + self.output_sizes
        for fan_in, fan_out in zip(sizes[:-1], sizes[1:]):
            key, wk, bk = jax.random.split(key, 3)
            bound = 1.0 / jnp.sqrt(jnp.float32(fan_in))  # torch.nn.Linear default init
            w = jax.random.uniform(wk, (fan_in, fan_out), jnp.float32, -bound, bound)
            b = jax.random.uniform(bk, (1, fan_out), jnp.float32, -bound, bound)
            self.weights.append(w)
            self.biases.append(b)

    def __call__(self, context_x, context_y, target_x=None):
        num_targets = target_x.shape[1] if target_x is not None else context_x.shape[1]
        return fused_deterministic_encoder(
            context_x, context_y, self.weights, self.biases, num_targets,
            compute_dtype=self.compute_dtype)


# ----------------------------------------------------------------------------
# Demo / smoke test
# ----------------------------------------------------------------------------
if __name__ == "__main__":
    key = jax.random.PRNGKey(0)
    k_model, kx, ky, kt = jax.random.split(key, 4)

    B, N_ctx, N_tgt = 2, 8, 12
    dx, dy = 3, 2
    output_sizes = [32, 32, 32]          # MLP hidden / output sizes; r_dim = 32

    context_x = jax.random.normal(kx, (B, N_ctx, dx), jnp.float32)
    context_y = jax.random.normal(ky, (B, N_ctx, dy), jnp.float32)
    target_x = jax.random.normal(kt, (B, N_tgt, dx), jnp.float32)

    model = DeterministicPallas(input_size=dx + dy, output_sizes=output_sizes,
                                key=k_model, compute_dtype=jnp.float32)

    out = model(context_x, context_y, target_x)
    out = jax.block_until_ready(out)

    # Reference in plain JAX (same params, original concat formulation).
    h = jnp.concatenate([context_x, context_y], axis=-1).reshape(B * N_ctx, dx + dy)
    for li, (w, b) in enumerate(zip(model.weights, model.biases)):
        h = h @ w + b
        if li < len(model.weights) - 1:
            h = jnp.maximum(h, 0.0)
    r_ref = h.reshape(B, N_ctx, output_sizes[-1])
    ref = jnp.broadcast_to(jnp.mean(r_ref, axis=1, keepdims=True),
                           (B, N_tgt, output_sizes[-1]))

    assert out.shape == (B, N_tgt, output_sizes[-1]), out.shape
    assert jnp.allclose(out, ref, atol=1e-5, rtol=1e-5), "f32 mismatch vs reference"

    # No-target_x path (target length = context length).
    out_ctx = jax.block_until_ready(model(context_x, context_y))
    assert out_ctx.shape == (B, N_ctx, output_sizes[-1]), out_ctx.shape
    assert jnp.allclose(out_ctx[:, :1], ref[:, :1], atol=1e-5, rtol=1e-5)

    # bf16 MXU-operand path (v6e/v7x optimization); f32 accumulation -> loose check.
    model_bf16 = DeterministicPallas(input_size=dx + dy, output_sizes=output_sizes,
                                     key=k_model, compute_dtype=jnp.bfloat16)
    out_bf16 = jax.block_until_ready(model_bf16(context_x, context_y, target_x))
    assert out_bf16.shape == (B, N_tgt, output_sizes[-1]), out_bf16.shape
    assert jnp.allclose(out_bf16, ref, atol=5e-2, rtol=5e-2), "bf16 mismatch vs reference"

    print("KERNEL_OK")
</pallas_src>

<mosaic_0001>
module attributes {stable_mosaic.version = 11 : i64} {
  func.func @_fused_encoder_kernel(%arg0: i32, %arg1: i32, %arg2: memref<1x8x5xf32, #tpu.memory_space<vmem>>, %arg3: memref<5x32xf32, #tpu.memory_space<vmem>>, %arg4: memref<1x32xf32, #tpu.memory_space<vmem>>, %arg5: memref<32x32xf32, #tpu.memory_space<vmem>>, %arg6: memref<1x32xf32, #tpu.memory_space<vmem>>, %arg7: memref<32x32xf32, #tpu.memory_space<vmem>>, %arg8: memref<1x32xf32, #tpu.memory_space<vmem>>, %arg9: memref<1x1x32xf32, #tpu.memory_space<vmem>>, %arg10: memref<1x32xf32, #tpu.memory_space<vmem>>) attributes {dimension_semantics = [#tpu.dimension_semantics<parallel>, #tpu.dimension_semantics<arbitrary>], iteration_bounds = array<i64: 2, 1>, scalar_prefetch = 0 : i64, scratch_operands = 1 : i64, tpu.core_type = #tpu.core_type<tc>, window_params = [{transform_indices = @transform_0, window_bounds = array<i64: 1, 8, 5>}, {pipeline_mode = #tpu.pipeline_mode<synchronous>, transform_indices = @transform_1, window_bounds = array<i64: 5, 32>}, {pipeline_mode = #tpu.pipeline_mode<synchronous>, transform_indices = @transform_2, window_bounds = array<i64: 1, 32>}, {pipeline_mode = #tpu.pipeline_mode<synchronous>, transform_indices = @transform_3, window_bounds = array<i64: 32, 32>}, {pipeline_mode = #tpu.pipeline_mode<synchronous>, transform_indices = @transform_4, window_bounds = array<i64: 1, 32>}, {pipeline_mode = #tpu.pipeline_mode<synchronous>, transform_indices = @transform_5, window_bounds = array<i64: 32, 32>}, {pipeline_mode = #tpu.pipeline_mode<synchronous>, transform_indices = @transform_6, window_bounds = array<i64: 1, 32>}, {transform_indices = @transform_7, window_bounds = array<i64: 1, 1, 32>}]} {
    %c0_i32 = arith.constant 0 : i32
    %0 = arith.cmpi eq, %arg1, %c0_i32 : i32
    %1 = arith.extui %0 : i1 to i32
    %c0_i32_0 = arith.constant 0 : i32
    %2 = arith.cmpi ne, %1, %c0_i32_0 : i32
    scf.if %2 {
      %cst_21 = arith.constant 0.000000e+00 : f32
      %27 = vector.broadcast %cst_21 : f32 to vector<1x32xf32>
      %c0_22 = arith.constant 0 : index
      %c0_23 = arith.constant 0 : index
      %28 = vector.load %arg10[%c0_22, %c0_23] : memref<1x32xf32, #tpu.memory_space<vmem>>, vector<1x32xf32>
      tpu.vector_store %arg10[%c0_22, %c0_23], %27 {strides = array<i32>} : memref<1x32xf32, #tpu.memory_space<vmem>>, vector<1x32xf32>,
    } else {
    }
    %c0 = arith.constant 0 : index
    %c0_1 = arith.constant 0 : index
    %c0_2 = arith.constant 0 : index
    %3 = vector.load %arg2[%c0, %c0_1, %c0_2] : memref<1x8x5xf32, #tpu.memory_space<vmem>>, vector<1x8x5xf32>
    %4 = vector.shape_cast %3 : vector<1x8x5xf32> to vector<8x5xf32>
    %c0_3 = arith.constant 0 : index
    %c0_4 = arith.constant 0 : index
    %5 = vector.load %arg3[%c0_3, %c0_4] : memref<5x32xf32, #tpu.memory_space<vmem>>, vector<5x32xf32>
    %cst = arith.constant dense<0.000000e+00> : vector<8x32xf32>
    %6 = tpu.matmul %4, %5, %cst {dimension_numbers = #tpu.dot_dimension_numbers<[1], [0], [0], [1], [0, 0, 1, 1], [], []>} : vector<8x5xf32>, vector<5x32xf32>, vector<8x32xf32> -> vector<8x32xf32>
    %c0_5 = arith.constant 0 : index
    %c0_6 = arith.constant 0 : index
    %7 = vector.load %arg4[%c0_5, %c0_6] : memref<1x32xf32, #tpu.memory_space<vmem>>, vector<1x32xf32>
    %8 = vector.broadcast %7 : vector<1x32xf32> to vector<8x32xf32>
    %9 = arith.addf %6, %8 : vector<8x32xf32>
    %cst_7 = arith.constant 0.000000e+00 : f32
    %10 = vector.broadcast %cst_7 : f32 to vector<8x32xf32>
    %11 = arith.maximumf %9, %10 : vector<8x32xf32>
    %c0_8 = arith.constant 0 : index
    %c0_9 = arith.constant 0 : index
    %12 = vector.load %arg5[%c0_8, %c0_9] : memref<32x32xf32, #tpu.memory_space<vmem>>, vector<32x32xf32>
    %cst_10 = arith.constant dense<0.000000e+00> : vector<8x32xf32>
    %13 = tpu.matmul %11, %12, %cst_10 {dimension_numbers = #tpu.dot_dimension_numbers<[1], [0], [0], [1], [0, 0, 1, 1], [], []>} : vector<8x32xf32>, vector<32x32xf32>, vector<8x32xf32> -> vector<8x32xf32>
    %c0_11 = arith.constant 0 : index
    %c0_12 = arith.constant 0 : index
    %14 = vector.load %arg6[%c0_11, %c0_12] : memref<1x32xf32, #tpu.memory_space<vmem>>, vector<1x32xf32>
    %15 = vector.broadcast %14 : vector<1x32xf32> to vector<8x32xf32>
    %16 = arith.addf %13, %15 : vector<8x32xf32>
    %cst_13 = arith.constant 0.000000e+00 : f32
    %17 = vector.broadcast %cst_13 : f32 to vector<8x32xf32>
    %18 = arith.maximumf %16, %17 : vector<8x32xf32>
    %19 = vector.shape_cast %18 : vector<8x32xf32> to vector<1x8x32xf32>
    %cst_14 = arith.constant dense<0.000000e+00> : vector<1x32xf32>
    %20 = vector.multi_reduction <add>, %19, %cst_14 [1] : vector<1x8x32xf32> to vector<1x32xf32>
    %c0_15 = arith.constant 0 : index
    %c0_16 = arith.constant 0 : index
    %21 = vector.load %arg10[%c0_15, %c0_16] : memref<1x32xf32, #tpu.memory_space<vmem>>, vector<1x32xf32>
    %22 = arith.addf %21, %20 : vector<1x32xf32>
    %c0_17 = arith.constant 0 : index
    %c0_18 = arith.constant 0 : index
    %23 = vector.load %arg10[%c0_17, %c0_18] : memref<1x32xf32, #tpu.memory_space<vmem>>, vector<1x32xf32>
    tpu.vector_store %arg10[%c0_17, %c0_18], %22 {strides = array<i32>} : memref<1x32xf32, #tpu.memory_space<vmem>>, vector<1x32xf32>,
    %c0_i32_19 = arith.constant 0 : i32
    %24 = arith.cmpi eq, %arg1, %c0_i32_19 : i32
    %25 = arith.extui %24 : i1 to i32
    %c0_i32_20 = arith.constant 0 : i32
    %26 = arith.cmpi ne, %25, %c0_i32_20 : i32
    scf.if %26 {
      %c0_21 = arith.constant 0 : index
      %c0_22 = arith.constant 0 : index
      %27 = vector.load %arg10[%c0_21, %c0_22] : memref<1x32xf32, #tpu.memory_space<vmem>>, vector<1x32xf32>
      %cst_23 = arith.constant 1.250000e-01 : f32
      %28 = vector.broadcast %cst_23 : f32 to vector<1x32xf32>
      %29 = arith.mulf %27, %28 : vector<1x32xf32>
      %c0_24 = arith.constant 0 : index
      %c0_25 = arith.constant 0 : index
      %30 = vector.load %arg7[%c0_24, %c0_25] : memref<32x32xf32, #tpu.memory_space<vmem>>, vector<32x32xf32>
      %cst_26 = arith.constant dense<0.000000e+00> : vector<1x32xf32>
      %31 = tpu.matmul %29, %30, %cst_26 {dimension_numbers = #tpu.dot_dimension_numbers<[1], [0], [0], [1], [0, 0, 1, 1], [], []>} : vector<1x32xf32>, vector<32x32xf32>, vector<1x32xf32> -> vector<1x32xf32>
      %c0_27 = arith.constant 0 : index
      %c0_28 = arith.constant 0 : index
      %32 = vector.load %arg8[%c0_27, %c0_28] : memref<1x32xf32, #tpu.memory_space<vmem>>, vector<1x32xf32>
      %33 = arith.addf %31, %32 : vector<1x32xf32>
      %34 = vector.shape_cast %33 : vector<1x32xf32> to vector<1x1x32xf32>
      %c0_29 = arith.constant 0 : index
      %c0_30 = arith.constant 0 : index
      %c0_31 = arith.constant 0 : index
      %35 = vector.load %arg9[%c0_29, %c0_30, %c0_31] : memref<1x1x32xf32, #tpu.memory_space<vmem>>, vector<1x1x32xf32>
      tpu.vector_store %arg9[%c0_29, %c0_30, %c0_31], %34 {strides = array<i32>} : memref<1x1x32xf32, #tpu.memory_space<vmem>>, vector<1x1x32xf32>,
    } else {
    }
    return
  }
  func.func @transform_0(%arg0: i32, %arg1: i32) -> (i32, i32, i32) {
    %c0_i32 = arith.constant 0 : i32
    %c0_i32_0 = arith.constant 0 : i32
    return %arg0, %arg1, %c0_i32 : i32, i32, i32
  }
  func.func @transform_1(%arg0: i32, %arg1: i32) -> (i32, i32) {
    %c0_i32 = arith.constant 0 : i32
    %c0_i32_0 = arith.constant 0 : i32
    %c0_i32_1 = arith.constant 0 : i32
    return %c0_i32, %c0_i32_0 : i32, i32
  }
  func.func @transform_2(%arg0: i32, %arg1: i32) -> (i32, i32) {
    %c0_i32 = arith.constant 0 : i32
    %c0_i32_0 = arith.constant 0 : i32
    %c0_i32_1 = arith.constant 0 : i32
    return %c0_i32, %c0_i32_0 : i32, i32
  }
  func.func @transform_3(%arg0: i32, %arg1: i32) -> (i32, i32) {
    %c0_i32 = arith.constant 0 : i32
    %c0_i32_0 = arith.constant 0 : i32
    %c0_i32_1 = arith.constant 0 : i32
    return %c0_i32, %c0_i32_0 : i32, i32
  }
  func.func @transform_4(%arg0: i32, %arg1: i32) -> (i32, i32) {
    %c0_i32 = arith.constant 0 : i32
    %c0_i32_0 = arith.constant 0 : i32
    %c0_i32_1 = arith.constant 0 : i32
    return %c0_i32, %c0_i32_0 : i32, i32
  }
  func.func @transform_5(%arg0: i32, %arg1: i32) -> (i32, i32) {
    %c0_i32 = arith.constant 0 : i32
    %c0_i32_0 = arith.constant 0 : i32
    %c0_i32_1 = arith.constant 0 : i32
    return %c0_i32, %c0_i32_0 : i32, i32
  }
  func.func @transform_6(%arg0: i32, %arg1: i32) -> (i32, i32) {
    %c0_i32 = arith.constant 0 : i32
    %c0_i32_0 = arith.constant 0 : i32
    %c0_i32_1 = arith.constant 0 : i32
    return %c0_i32, %c0_i32_0 : i32, i32
  }
  func.func @transform_7(%arg0: i32, %arg1: i32) -> (i32, i32, i32) {
    %c0_i32 = arith.constant 0 : i32
    %c0_i32_0 = arith.constant 0 : i32
    %c0_i32_1 = arith.constant 0 : i32
    return %arg0, %c0_i32, %c0_i32_0 : i32, i32, i32
  }
}

</mosaic_0001>

<bundles_post_ra>
// kernel: tpu_custom_call.1
= control target key start
LH: loop header
LB: loop body
LE: loop exit
PB: predicated region body
PF: predicated region fallthrough
CT: control target
= control target key end

     0   :  { %12 = vsyncpa [#allocation4], 0  ;;  %s1260_s0 = inlined_call_operand.vmem [shape: f32[2,8,5], index: 0, kind: input, shape index: {}]   ;;  %s1261_s1 = inlined_call_operand.hbm [shape: f32[5,32], index: 1, kind: input, shape index: {}]   ;;  %s1262_s2 = inlined_call_operand.vmem [shape: f32[1,32], index: 2, kind: input, shape index: {}]   ;;  %s1263_s3 = inlined_call_operand.vmem [shape: f32[32,32], index: 3, kind: input, shape index: {}]   ;;  %s1264_s4 = inlined_call_operand.vmem [shape: f32[1,32], index: 4, kind: input, shape index: {}]   ;;  %s1265_s5 = inlined_call_operand.hbm [shape: f32[32,32], index: 5, kind: input, shape index: {}]   ;;  %s1266_s6 = inlined_call_operand.vmem [shape: f32[1,32], index: 6, kind: input, shape index: {}]   ;;  %s1267_s7 = inlined_call_operand.hbm [shape: f32[2,1,32], index: 7, kind: output, shape index: {}]  }
   0x1   :  { %13 = vsyncpa [#allocation7], 0 }
   0x2   :  { %14 = vsyncpa [#allocation5], 0 }
   0x3   :  { %16 = vsyncpa [#allocation5 + $0x1], 0  ;;  %s1043_s24 = smov 0   ;;  %s1045_s25 = smov 0  }
   0x4   :  { %s1047_s26 = smov 0   ;;  %s1049_s27 = smov 0  }
   0x5   :  { %s1051_s28 = smov 0   ;;  %s1053_s29 = smov 0  }
   0x6 LB: > { %s700_s30 = sadd.s32 4294967295, %s993_s29   ;;  %s701_s8 = sadd.s32 4294967294, %s993_s29   ;;  %s993_s29 = sphi %s1053_s29, %s22_s29   ;;  %s989_s28 = sphi %s1051_s28, %s1288_s28   ;;  %s985_s27 = sphi %s1049_s27, %s1287_s27   ;;  %s981_s26 = sphi %s1047_s26, %s1286_s26   ;;  %s977_s25 = sphi %s1045_s25, %s1285_s25   ;;  %s973_s24 = sphi %s1043_s24, %s1284_s24  }
   0x7   : > { %s34_s9 = sadd.s32 1, %s989_s28  ;;  %s195_s10 = sadd.s32 1, %s981_s26 }
   0x8   : > { %p36_p0 = scmp.ge.s32.totalorder %s34_s9, 2  ;;  %p205_p1 = scmp.ne.s32.totalorder %s981_s26, %s977_s25 }
   0x9   : > { %p206_p2 = scmp.eq.s32.totalorder %s700_s30, 1  ;;  %p211_p3 = scmp.ne.s32.totalorder %s977_s25, %s973_s24 }
   0xa   : > { %s1290_s9 = smov (%p36_p0, %s34_s9), 0  ;;  %p212_p5 = scmp.eq.s32.totalorder %s701_s8, 1 }
   0xb   : > { %1273 = sst [smem:[#allocation12_spill]] %s1290_s9  ;;  %p1083_p4 = por %p206_p2, %p205_p1 }
   0xc   : > { %s192_s12 = ssub.s32 %s989_s28, %s1290_s9  ;;  %p702_p6 = scmp.ge.s32.totalorder %s993_s29, 1 }
   0xd   : > { %s1274_s11 = scalar_select %p1083_p4, 1, 0 }
   0xe   : > { %p193_p7 = scmp.eq.s32.totalorder %s192_s12, 0  ;;  %p1090_p8 = por %p212_p5, %p211_p3 }
   0xf   : > { %p219_p9 = scmp.lt.s32.totalorder %s993_s29, 3  ;;  %p1102_p11 = scmp.eq.s32.totalorder %s700_s30, 0 }
  0x10   : > { %s1275_s13 = scalar_select %p1090_p8, 1, 0 }
  0x11   : > { %s1096_s14 = scalar_select %p193_p7, %s981_s26, %s195_s10  }
  0x12   : > { %p1098_p10 = pnand %p702_p6, %p219_p9  ;;  %s995_s17 = smov [#allocation3]  }
  0x13   : > { %s1277_s16 = scalar_select %p1102_p11, 1, 0 }
  0x14   : > { %s1276_s15 = scalar_select %p1098_p10, 1, 0 }
  0x15   : > { %p780_p12 = pneg %p1098_p10  ;;  %s232_s18 = sshll.u32 %s995_s17, 4  ;;  %s233_s18 = int_to_ptr.vmem [resolvable:$true] %s232_s18 }
  0x16   : > { %s996_s19 = smov [#allocation6]   ;;  %s851_s30 = scalar_lea.hbm %s1261_s1, 128 }
  0x17   : > { %s251_s20 = sshll.u32 %s996_s19, 4  ;;  %p1110_p13 = pnand %p1102_p11, %p780_p12  ;;  %s1114_s20 = int_to_ptr.vmem [resolvable:$true] %s251_s20 }
  0x18   : > { %p852_p0 = scmp.ne.s32.totalorder %s1261_s1, %s851_s30  ;;  %p858_p5 = scmp.lt.u32.totalorder %s851_s30, %s1261_s1 }
  0x19   : > { %p853_p1 = pneg %p1110_p13 }
  0x1b   : > { %p854_p2 = pnand %p853_p1, %p852_p0 }
  0x1d   : > { %p855_p3 = pneg %p854_p2 }
  0x1f   : > { %p860_p6 = pnand %p858_p5, %p855_p3 }
  0x21   : > { %863 = shalt.err (!%p860_p6)
}
  0x22   : > { %s864_s19 = scalar_lea.vmem %s233_s18, 128  ;;  %p872_p8 = scmp.lt.s32.totalorder %s233_s18, %s233_s18 }
  0x23   : > { %p865_p7 = scmp.ne.s32.totalorder %s233_s18, %s864_s19  ;;  %p873_p4 = scmp.lt.s32.totalorder %s864_s19, %s864_s19 }
  0x25   : > { %p867_p9 = pnand %p865_p7, %p853_p1  ;;  %p874_p11 = por %p873_p4, %p872_p8 }
  0x27   : > { %p868_p12 = pneg %p867_p9 }
  0x29   : > { %p875_p10 = pnand %p874_p11, %p868_p12 }
  0x2b   : > { %878 = shalt.err (!%p875_p10)
}
  0x2c   : > { %783 = dma.hbm_to_vmem [thread:$0]  (!%p1110_p13), %s1261_s1, 128, %s233_s18, [#allocation4]  }
  0x2d   : > { %s879_s10 = scalar_lea.hbm %s1265_s5, 512 }
  0x2e   : > { %p880_p0 = scmp.ne.s32.totalorder %s1265_s5, %s879_s10  ;;  %p886_p10 = scmp.lt.u32.totalorder %s879_s10, %s1265_s5 }
  0x30   : > { %p882_p4 = pnand %p880_p0, %p853_p1 }
  0x32   : > { %p883_p8 = pneg %p882_p4 }
  0x34   : > { %p888_p11 = pnand %p886_p10, %p883_p8 }
  0x36   : > { %891 = shalt.err (!%p888_p11)
}
  0x37   : > { %s892_s18 = scalar_lea.vmem %s1114_s20, 512  ;;  %p900_p6 = scmp.lt.s32.totalorder %s1114_s20, %s1114_s20 }
  0x38   : > { %p893_p2 = scmp.ne.s32.totalorder %s1114_s20, %s892_s18  ;;  %p901_p7 = scmp.lt.s32.totalorder %s892_s18, %s892_s18 }
  0x3a   : > { %p895_p3 = pnand %p893_p2, %p853_p1  ;;  %p902_p9 = por %p901_p7, %p900_p6 }
  0x3c   : > { %p896_p5 = pneg %p895_p3 }
  0x3e   : > { %p903_p12 = pnand %p902_p9, %p896_p5 }
  0x40   : > { %906 = shalt.err (!%p903_p12)
}
  0x41   : > { %s997_s9 = smov 128   ;;  %s998_s22 = smov 8  }
  0x42   : > { %786 = dma.hbm_to_vmem [thread:$0]  (!%p1110_p13), %s1265_s5, 512, %s1114_s20, [#allocation7], %s997_s9, %s997_s9, %s998_s22  }
  0x43   : > { %p1279_p0 = scmp.ne.s32.totalorder %s1276_s15, 0 }
  0x44   : > { %p1280_p1 = scmp.ne.s32.totalorder (!%p1279_p0), %s1277_s16, 0 }
  0x45   : > { %280 = sbr.rel (%p1279_p0) target bundleno = 771 (0x303), region = 48 }
  0x4c   : > { %960 = dma.done.wait (%p1280_p1), [#allocation4], 128  }
  0x4d   : > { %962 = vsyncadd (%p1280_p1), [#allocation4], 4294967168 }
  0x4e   : > { %964 = dma.done.wait (%p1280_p1), [#allocation7], 512  }
  0x4f   : > { %966 = vsyncadd (%p1280_p1), [#allocation7], 4294966784  ;;  %vm328_vm0 = vcmask 253952   ;;  %v999_v0 = vmov 0.0   ;;  %vm1000_vm1 = vmmov 0   ;;  %p317_p13 = scmp.lt.s32.totalorder %s985_s27, 1 }
  0x50   : > { %329 = vst.msk [vmem:[#allocation2] sm:$0x1] %vm328_vm0, %v999_v0  ;;  %731 = vmatprep.subr.mxu0 %v999_v0  ;;  %733 = vmatprep.mubr.msk.f32.mxu0 %vm1000_vm1, %v999_v0  ;;  %v1001_v1 = vmov 0.0|0.0   ;;  %vm343_vm2 = vcmask 1044480   ;;  %vm339_vm3 = vcmask 39936   ;;  %v418_v4 = vld [vmem:[%s1263_s3] sm:$0xff] }
  0x51   : > { %758 = vmatprep.subr.bf16.mxu1 %v1001_v1  ;;  %744 = vmatprep.mubr.msk.f32.mxu1 %vm1000_vm1, %v999_v0  ;;  %s318_s15 = scalar_select %p317_p13, %s985_s27, 1  ;;  %v331_v2 = vld [vmem:[#allocation3] sm:$0x1f]  ;;  %v419_v5 = vld [vmem:[%s1263_s3 + $0x8] sm:$0xff]  ;;  %v420_v7 = vld [vmem:[%s1263_s3 + $0x10] sm:$0xff]  ;;  %vm429_vm4 = vcmask 261120  }
  0x52   : > { %732 = vmatpush3.msk.msra.mxu0 %vm343_vm2, %v331_v2  ;;  %v759_v6 = vpack.c.bf16 %v419_v5, %v418_v4  ;;  %v421_v8 = vld [vmem:[%s1263_s3 + $0x18] sm:$0xff]  ;;  %v710_v10 = vld [vmem:[%s1262_s2] ss:$0 sm:$0xff]  ;;  %v520_v15 = vld [vmem:[#allocation6] sm:$0xff]  ;;  %s315_s21 = sand.u32 1, %s977_s25   ;;  %s716_s12 = sshll.u32 %s985_s27, 4 }
  0x53   : > { %s709_s20 = sshll.u32 %s318_s15, 3  ;;  %764 = vmatprep.subr.bf16.mxu0 %v1001_v1  ;;  %v762_v9 = vpack.c.bf16 %v421_v8, %v420_v7  ;;  %v521_v16 = vld [vmem:[#allocation6 + $0x8] sm:$0xff]  ;;  %v522_v17 = vld [vmem:[#allocation6 + $0x10] sm:$0xff]  ;;  %v523_v19 = vld [vmem:[#allocation6 + $0x18] sm:$0xff]  ;;  %s316_s17 = scalar_lea.vmem [#allocation8], %s315_s21 }
  0x54   : > { %s323_s8 = scalar_lea.vmem %s1260_s0, %s709_s20  ;;  %760 = vmatpush3.bf16.msra.mxu1 %v759_v6  ;;  %v765_v18 = vpack.c.bf16 %v521_v16, %v520_v15  ;;  %v768_v20 = vpack.c.bf16 %v523_v19, %v522_v17  ;;  %v713_v21 = vld [vmem:[%s1264_s4] ss:$0 sm:$0xff]  ;;  %s612_s19 = sshll.u32 %s316_s17, 4  ;;  %s1214_s19 = int_to_ptr.vmem [resolvable:$true] %s612_s19 }
  0x55   : > { %v330_v3 = vld [vmem:[%s323_s8] sm:$0xff]  ;;  %761 = vmatprep.subr.bf16.mxu1 %v1001_v1  ;;  %s1212_s22 = scalar_lea.hbm %s1267_s7, %s716_s12  ;;  %s600_s23 = scalar_lea.sflag [#allocation5], %s315_s21 }
  0x56   : > { %734 = vmatmul.mubr.msk.f32.vlgmr.msra.gmra.mrb[0].mxu0 %vm339_vm3, %v330_v3  ;;  %v524_v37 = vld [vmem:[%s1266_s6] sm:$0x1]  ;;  %s907_s30 = scalar_lea.vmem %s1214_s19, 16  ;;  %p1281_p8 = scmp.ne.s32.totalorder %s1274_s11, 0 }
  0x57   : > { %755 = vmatprep.mubr.msk.f32.mxu0 %vm1000_vm1, %v999_v0  ;;  %766 = vmatpush3.bf16.msra.mxu0 %v765_v18  ;;  %v511_v32 = vld [vmem:[#allocation2] sm:$0x1]  ;;  %p908_p4 = scmp.ne.s32.totalorder %s1214_s19, %s907_s30  ;;  %s1002_s27 = smov [#allocation8]  }
  0x58   : > { %763 = vmatpush3.bf16.msra.mxu1 %v762_v9  ;;  %767 = vmatprep.subr.bf16.mxu0 %v1001_v1  ;;  %s911_s15 = sshll.u32 %s1002_s27, 4  ;;  %s912_s15 = int_to_ptr.vmem [resolvable:$false] %s911_s15 }
  0x59   : > { %p909_p10 = pnand %p908_p4, %p1281_p8  ;;  %s913_s20 = scalar_lea.vmem %s912_s15, 32 }
  0x5a   : > { %p914_p2 = scmp.lt.s32.totalorder %s1214_s19, %s912_s15  ;;  %p915_p3 = scmp.lt.s32.totalorder %s913_s20, %s907_s30 }
  0x5b   : > { %769 = vmatpush3.bf16.msra.mxu0 %v768_v20  ;;  %p910_p11 = pneg %p909_p10 }
  0x5c   : > { %p916_p5 = por %p915_p3, %p914_p2 }
  0x5e   : > { %p917_p6 = pnand %p916_p5, %p910_p11 }
 0x129   : > { %v413_v11 = vpop.f32.mrb[0].mxu0 }
 0x12a   : > { %v414_v12 = vadd.f32 %v710_v10, %v413_v11  ;;  %v735_v13 = vpop.f32.mrb[1].mxu0 }
 0x12c   : > { %v417_v14 = vmax.f32 %v414_v12, 0.0 }
 0x12e   : > { %745 = vmatmul.mubr.msk.f32.vlgmr.msra.gmra.mrb[0].mxu1 %vm429_vm4, %v417_v14 }
 0x201   : > { %v499_v22 = vpop.f32.mrb[0].mxu1 }
 0x202   : > { %v500_v23 = vadd.f32 %v713_v21, %v499_v22  ;;  %v746_v24 = vpop.f32.mrb[1].mxu1 }
 0x204   : > { %v503_v25 = vmax.f32 %v500_v23, 0.0 }
 0x206   : > { %v504_v26 = vsel %vm429_vm4, %v503_v25, 0.0 }
 0x207   : > { %v505_v27 = vrot.slane %v504_v26, 4 }
 0x209   : > { %v506_v28 = vadd.f32 %v505_v27, %v504_v26 }
 0x20b   : > { %v507_v29 = vrot.slane %v506_v28, 2 }
 0x20d   : > { %v508_v30 = vadd.f32 %v507_v29, %v506_v28 }
 0x20f   : > { %v509_v31 = vrot.slane %v508_v30, 1 }
 0x211   : > { %v510_v33 = vadd.f32 %v509_v31, %v508_v30 }
 0x213   : > { %v512_v34 = vadd.f32 %v511_v32, %v510_v33 }
 0x215   : > { %514 = vst.msk [vmem:[#allocation2] sm:$0x1] %vm328_vm0, %v512_v34 }
 0x21c   : > { %v518_v35 = vld [vmem:[#allocation2] sm:$0x1] }
 0x21d   : > { %v519_v36 = vmul.f32 0.125, %v518_v35 }
 0x21f   : > { %756 = vmatmul.mubr.msk.f32.vlgmr.msra.gmra.mrb[2].mxu0 %vm429_vm4, %v519_v36 }
 0x2f2   : > { %v594_v38 = vpop.f32.mrb[2].mxu0 }
 0x2f3   : > { %v595_v39 = vadd.f32 %v594_v38, %v524_v37  ;;  %v757_v40 = vpop.f32.mrb[3].mxu0 }
 0x2f5   : > { %598 = vst.msk [vmem:[%s316_s17] sm:$0x1] %vm328_vm0, %v595_v39 }
 0x2f6   : > { %920 = shalt.err (!%p917_p6)
}
 0x2f7   : > { %s921_s16 = scalar_lea.hbm %s1212_s22, 16  ;;  %s925_s10 = scalar_lea.hbm %s1267_s7, 32 }
 0x2f8   : > { %p922_p7 = scmp.ne.s32.totalorder %s1212_s22, %s921_s16  ;;  %p926_p0 = scmp.lt.u32.totalorder %s1212_s22, %s1267_s7 }
 0x2f9   : > { %p927_p1 = scmp.lt.u32.totalorder %s925_s10, %s921_s16  ;;  %p929_p4 = scmp.lt.u32.totalorder %s921_s16, %s1212_s22 }
 0x2fa   : > { %p923_p9 = pnand %p922_p7, %p1281_p8 }
 0x2fb   : > { %p928_p13 = por %p927_p1, %p926_p0 }
 0x2fc   : > { %p924_p12 = pneg %p923_p9 }
 0x2fd   : > { %p930_p10 = por %p929_p4, %p928_p13 }
 0x2ff   : > { %p931_p11 = pnand %p930_p10, %p924_p12 }
 0x301   : > { %934 = shalt.err (!%p931_p11)
}
 0x302   : > { %778 = dma.vmem_to_hbm [thread:$0]  (%p1281_p8), %s1214_s19, 16, %s1212_s22, %s600_s23  }
 0x303 PF: > { %p795_p2 = scmp.ge.s32.totalorder %s993_s29, 2  ;;  %s624_s18 = sand.u32 1, %s973_s24  }
 0x304   : > { %p1282_p3 = scmp.ne.s32.totalorder %s1275_s13, 0  ;;  %s625_s9 = scalar_lea.sflag [#allocation5], %s624_s18 }
 0x306   : > { %p788_p5 = pnand %p795_p2, %p1282_p3 }
 0x308   : > { %968 = dma.done.wait (!%p788_p5), %s625_s9, 16  }
 0x309   : > { %970 = vsyncadd (!%p788_p5), %s625_s9, 4294967280  ;;  %s22_s29 = sadd.s32 1, %s993_s29   ;;  %s1283_s11 = sld [smem:[#allocation12_spill]] }
 0x30a   : > { %p19_p6 = scmp.ge.s32.totalorder %s22_s29, 4   ;;  %s1284_s24 = smov %s977_s25 }
 0x30b   : > { %s1285_s25 = smov %s981_s26  ;;  %s1286_s26 = smov %s1096_s14 }
 0x30c   : > { %s1287_s27 = smov %s989_s28  ;;  %21 = sbr.rel (!%p19_p6) target bundleno = 6 (0x6), region = 100 }
 0x30f   : > { %s1288_s28 = smov %s1283_s11 }
 0x313   :  { %629 = vsyncpa [#allocation4], 1 }
 0x314   :  { %631 = vsyncpa [#allocation4 + $0x1], 1 }
 0x315   :  { %632 = vsyncpa [#allocation7], 1 }
 0x316   :  { %633 = vsyncpa [#allocation5], 1 }
 0x317   :  { %635 = vsyncpa [#allocation5 + $0x1], 1 }

</bundles_post_ra>
